<compile_context>
chip_gen: v6e
topology: v6e:2x2x1
jax: 0.10.0
libtpu: 0.0.40
codegen_flags: <defaults>
</compile_context>

<pallas_src>
import jax
import jax.numpy as jnp
from jax.experimental import pallas as pl
from jax.experimental.pallas import tpu as pltpu

# ---- model hyper-parameters (small, consistent with the module) ----
B = 2                       # batch
T = 8                       # sequence length
E = 32                      # num_embedding
NUM_HEADS = 4
HEAD_SIZE = E // NUM_HEADS  # 8
HIDDEN = 4 * E              # 128
EPS = 1e-5
BT = B * T                  # 16


def _layer_norm(v, w, b):
    """Row-wise LayerNorm over the last (lane) dim. w, b are (1, E) f32."""
    mu = jnp.mean(v, axis=-1, keepdims=True)
    var = jnp.mean((v - mu) ** 2, axis=-1, keepdims=True)
    return (v - mu) * jax.lax.rsqrt(var + EPS) * w + b


def block_kernel(x_ref, w_attn_ref, w_ff1_ref, w_ff2_ref, vec_ref, o_ref):
    """Single invocation: the entire (B*T, E) problem is VMEM-resident."""
    x = x_ref[...]                                   # (16, 32) f32
    vecs = vec_ref[...]                              # (8, 128) f32 packed slab
    b1   = vecs[0:1, :]                              # (1, 128)
    bp   = vecs[1:2, :E]                             # (1, 32)
    ln1w = vecs[2:3, :E]
    ln1b = vecs[3:4, :E]
    ln2w = vecs[4:5, :E]
    ln2b = vecs[5:6, :E]
    b2   = vecs[6:7, :E]

    # ---- x = x + self_attn(lay_norm1(x)) ----
    xn = _layer_norm(x, ln1w, ln1b)                  # (16, 32) f32
    xn_b = xn.astype(jnp.bfloat16)                   # MXU operands in bf16

    # One batch-(2H) einsum against the stacked attention weights:
    #   groups 0..H-1   : xn @ M_h      (M_h = Wq_h/sqrt(E) @ Wk_h^T)
    #   groups H..2H-1  : xn @ Wvp_h    (Wvp_h = Wv_h @ Wp_rows_h, proj fused)
    xg = jnp.broadcast_to(xn_b[None], (2 * NUM_HEADS, BT, E))        # (8,16,32)
    proj = jnp.einsum('gne,gef->gnf', xg, w_attn_ref[...],
                      preferred_element_type=jnp.float32)            # (8,16,32)

    # Head-major grouping g = h*B + b.  The reshapes split the sublane dim
    # 16 -> (2, 8) exactly on the 8-sublane tile boundary (layout no-op).
    qm = proj[:NUM_HEADS].reshape(NUM_HEADS * B, T, E)               # (8,8,32)
    vg = proj[NUM_HEADS:].reshape(NUM_HEADS * B, T, E)               # (8,8,32)
    kx = jnp.broadcast_to(xn_b.reshape(1, B, T, E),
                          (NUM_HEADS, B, T, E)).reshape(NUM_HEADS * B, T, E)

    # Scores (scale already folded into M_h).  NOTE: the torch Head scales by
    # C**0.5 with C = num_embedding (not head_size), and applies no causal mask.
    s = jnp.einsum('gtf,gsf->gts', qm.astype(jnp.bfloat16), kx,
                   preferred_element_type=jnp.float32)               # (8,8,8)
    s = s - jnp.max(s, axis=-1, keepdims=True)
    p = jnp.exp(s)
    p = p * pl.reciprocal(jnp.sum(p, axis=-1, keepdims=True), approx=True)

    # P @ (V_h Wp_h): already E-wide per head; head sum = one leading-dim reduce.
    oh = jnp.einsum('gts,gsf->gtf', p.astype(jnp.bfloat16),
                    vg.astype(jnp.bfloat16),
                    preferred_element_type=jnp.float32)              # (8,8,32)
    att = jnp.sum(oh.reshape(NUM_HEADS, BT, E), axis=0)              # (16,32)

    x1 = x + att + bp                                                # residual 1

    # ---- x = x + feed_fwd(lay_norm2(x)) ----
    x1n = _layer_norm(x1, ln2w, ln2b)
    h1 = jnp.dot(x1n.astype(jnp.bfloat16), w_ff1_ref[...],
                 preferred_element_type=jnp.float32) + b1            # (16,128)
    h1 = jnp.maximum(h1, 0.0)                                        # ReLU
    ff = jnp.dot(h1.astype(jnp.bfloat16), w_ff2_ref[...],
                 preferred_element_type=jnp.float32) + b2            # (16,32)

    o_ref[...] = (x1 + ff).astype(o_ref.dtype)


def prepare_params(p):
    """One-time packing of the torch-layout params into 4 constant operands."""
    scale = 1.0 / (E ** 0.5)
    m_heads, vp_heads = [], []
    for h in range(NUM_HEADS):
        sl = slice(h * HEAD_SIZE, (h + 1) * HEAD_SIZE)
        m_heads.append((p["wq"][:, sl] * scale) @ p["wk"][:, sl].T)  # (E, E)
        vp_heads.append(p["wv"][:, sl] @ p["wp"][sl, :])             # (E, E)
    w_attn = jnp.stack(m_heads + vp_heads, axis=0).astype(jnp.bfloat16)  # (2H,E,E)

    vecs = jnp.zeros((8, HIDDEN), jnp.float32)
    vecs = vecs.at[0, :].set(p["b1"])
    vecs = vecs.at[1, :E].set(p["bp"])
    vecs = vecs.at[2, :E].set(p["ln1w"])
    vecs = vecs.at[3, :E].set(p["ln1b"])
    vecs = vecs.at[4, :E].set(p["ln2w"])
    vecs = vecs.at[5, :E].set(p["ln2b"])
    vecs = vecs.at[6, :E].set(p["b2"])

    return dict(w_attn=w_attn,
                w_ff1=p["w1"].astype(jnp.bfloat16),   # (E, 4E)
                w_ff2=p["w2"].astype(jnp.bfloat16),   # (4E, E)
                vecs=vecs)                            # (8, 128) f32


@jax.jit
def block_forward(x, prepped):
    """x: (B, T, E) float32. prepped: output of prepare_params."""
    vmem = pl.BlockSpec(memory_space=pltpu.MemorySpace.VMEM)
    operands = (x.reshape(BT, E), prepped["w_attn"], prepped["w_ff1"],
                prepped["w_ff2"], prepped["vecs"])
    out = pl.pallas_call(
        block_kernel,
        out_shape=jax.ShapeDtypeStruct((BT, E), x.dtype),
        in_specs=[vmem] * len(operands),
        out_specs=vmem,
    )(*operands)
    return out.reshape(B, T, E)


def init_params(key):
    ks = jax.random.split(key, 8)
    scale = 0.1
    return dict(
        wq=scale * jax.random.normal(ks[0], (E, E), jnp.float32),
        wk=scale * jax.random.normal(ks[1], (E, E), jnp.float32),
        wv=scale * jax.random.normal(ks[2], (E, E), jnp.float32),
        wp=scale * jax.random.normal(ks[3], (E, E), jnp.float32),
        bp=scale * jax.random.normal(ks[4], (E,), jnp.float32),
        # LayerNorm default torch init: weight=1, bias=0
        ln1w=jnp.ones((E,), jnp.float32), ln1b=jnp.zeros((E,), jnp.float32),
        ln2w=jnp.ones((E,), jnp.float32), ln2b=jnp.zeros((E,), jnp.float32),
        w1=scale * jax.random.normal(ks[5], (E, HIDDEN), jnp.float32),
        b1=scale * jax.random.normal(ks[6], (HIDDEN,), jnp.float32),
        w2=scale * jax.random.normal(ks[7], (HIDDEN, E), jnp.float32),
        b2=jnp.zeros((E,), jnp.float32),
    )


def block_forward_ref(x, p):
    """Pure-JAX f32 reference mirroring the PyTorch forward (eval mode)."""
    def ln(v, w, b):
        mu = v.mean(-1, keepdims=True)
        var = ((v - mu) ** 2).mean(-1, keepdims=True)
        return (v - mu) / jnp.sqrt(var + EPS) * w + b

    xn = ln(x, p["ln1w"], p["ln1b"])
    q = xn @ p["wq"]
    k = xn @ p["wk"]
    v = xn @ p["wv"]
    outs = []
    for h in range(NUM_HEADS):
        sl = slice(h * HEAD_SIZE, (h + 1) * HEAD_SIZE)
        wei = jnp.einsum("btd,bsd->bts", q[..., sl], k[..., sl]) / (E ** 0.5)
        wei = jax.nn.softmax(wei, axis=-1)
        outs.append(jnp.einsum("bts,bsd->btd", wei, v[..., sl]))
    attn = jnp.concatenate(outs, -1) @ p["wp"] + p["bp"]
    x1 = x + attn
    x1n = ln(x1, p["ln2w"], p["ln2b"])
    ff = jnp.maximum(x1n @ p["w1"] + p["b1"], 0.0) @ p["w2"] + p["b2"]
    return x1 + ff


if __name__ == "__main__":
    key = jax.random.PRNGKey(0)
    kx, kp = jax.random.split(key)
    x = jax.random.normal(kx, (B, T, E), jnp.float32)
    params = init_params(kp)
    prepped = prepare_params(params)

    out = jax.block_until_ready(block_forward(x, prepped))
    ref = block_forward_ref(x, params)

    assert out.shape == (B, T, E)
    max_err = float(jnp.max(jnp.abs(out - ref)))
    # Tolerance covers bf16 MXU operands (f32 accumulation), the fused
    # Wq@Wk^T / Wv@Wp weight products, and the EUP approx-reciprocal softmax.
    assert max_err < 3e-2, f"mismatch vs reference: max abs err {max_err}"

    print("KERNEL_OK")
</pallas_src>

<mosaic_0001>
module attributes {stable_mosaic.version = 11 : i64} {
  func.func @block_kernel(%arg0: memref<16x32xf32, #tpu.memory_space<vmem>>, %arg1: memref<8x32x32xbf16, #tpu.memory_space<vmem>>, %arg2: memref<32x128xbf16, #tpu.memory_space<vmem>>, %arg3: memref<128x32xbf16, #tpu.memory_space<vmem>>, %arg4: memref<8x128xf32, #tpu.memory_space<vmem>>, %arg5: memref<16x32xf32, #tpu.memory_space<vmem>>) attributes {dimension_semantics = [], scalar_prefetch = 0 : i64, scratch_operands = 0 : i64, tpu.core_type = #tpu.core_type<tc>} {
    %c0 = arith.constant 0 : index
    %c0_0 = arith.constant 0 : index
    %0 = vector.load %arg0[%c0, %c0_0] : memref<16x32xf32, #tpu.memory_space<vmem>>, vector<16x32xf32>
    %c0_1 = arith.constant 0 : index
    %c0_2 = arith.constant 0 : index
    %1 = vector.load %arg4[%c0_1, %c0_2] : memref<8x128xf32, #tpu.memory_space<vmem>>, vector<8x128xf32>
    %2 = vector.extract_strided_slice %1 {offsets = [0, 0], sizes = [1, 128], strides = [1, 1]} : vector<8x128xf32> to vector<1x128xf32>
    %3 = vector.extract_strided_slice %1 {offsets = [1, 0], sizes = [1, 32], strides = [1, 1]} : vector<8x128xf32> to vector<1x32xf32>
    %4 = vector.extract_strided_slice %1 {offsets = [2, 0], sizes = [1, 32], strides = [1, 1]} : vector<8x128xf32> to vector<1x32xf32>
    %5 = vector.extract_strided_slice %1 {offsets = [3, 0], sizes = [1, 32], strides = [1, 1]} : vector<8x128xf32> to vector<1x32xf32>
    %6 = vector.extract_strided_slice %1 {offsets = [4, 0], sizes = [1, 32], strides = [1, 1]} : vector<8x128xf32> to vector<1x32xf32>
    %7 = vector.extract_strided_slice %1 {offsets = [5, 0], sizes = [1, 32], strides = [1, 1]} : vector<8x128xf32> to vector<1x32xf32>
    %8 = vector.extract_strided_slice %1 {offsets = [6, 0], sizes = [1, 32], strides = [1, 1]} : vector<8x128xf32> to vector<1x32xf32>
    %cst = arith.constant dense<0.000000e+00> : vector<16xf32>
    %9 = vector.multi_reduction <add>, %0, %cst [1] : vector<16x32xf32> to vector<16xf32>
    %10 = vector.shape_cast %9 : vector<16xf32> to vector<16x1xf32>
    %cst_3 = arith.constant 3.200000e+01 : f32
    %11 = vector.broadcast %cst_3 : f32 to vector<16x1xf32>
    %12 = arith.divf %10, %11 : vector<16x1xf32>
    %13 = vector.broadcast %12 : vector<16x1xf32> to vector<16x32xf32>
    %14 = arith.subf %0, %13 : vector<16x32xf32>
    %15 = arith.mulf %14, %14 : vector<16x32xf32>
    %cst_4 = arith.constant dense<0.000000e+00> : vector<16xf32>
    %16 = vector.multi_reduction <add>, %15, %cst_4 [1] : vector<16x32xf32> to vector<16xf32>
    %17 = vector.shape_cast %16 : vector<16xf32> to vector<16x1xf32>
    %cst_5 = arith.constant 3.200000e+01 : f32
    %18 = vector.broadcast %cst_5 : f32 to vector<16x1xf32>
    %19 = arith.divf %17, %18 : vector<16x1xf32>
    %20 = vector.broadcast %12 : vector<16x1xf32> to vector<16x32xf32>
    %21 = arith.subf %0, %20 : vector<16x32xf32>
    %cst_6 = arith.constant 9.99999974E-6 : f32
    %22 = vector.broadcast %cst_6 : f32 to vector<16x1xf32>
    %23 = arith.addf %19, %22 : vector<16x1xf32>
    %24 = math.rsqrt %23 : vector<16x1xf32>
    %25 = vector.broadcast %24 : vector<16x1xf32> to vector<16x32xf32>
    %26 = arith.mulf %21, %25 : vector<16x32xf32>
    %27 = vector.broadcast %4 : vector<1x32xf32> to vector<16x32xf32>
    %28 = arith.mulf %26, %27 : vector<16x32xf32>
    %29 = vector.broadcast %5 : vector<1x32xf32> to vector<16x32xf32>
    %30 = arith.addf %28, %29 : vector<16x32xf32>
    %31 = arith.truncf %30 : vector<16x32xf32> to vector<16x32xbf16>
    %32 = vector.shape_cast %31 : vector<16x32xbf16> to vector<1x16x32xbf16>
    %33 = vector.shape_cast %32 : vector<1x16x32xbf16> to vector<1x16x32xbf16>
    %34 = vector.broadcast %33 : vector<1x16x32xbf16> to vector<8x16x32xbf16>
    %c0_7 = arith.constant 0 : index
    %c0_8 = arith.constant 0 : index
    %c0_9 = arith.constant 0 : index
    %35 = vector.load %arg1[%c0_7, %c0_8, %c0_9] : memref<8x32x32xbf16, #tpu.memory_space<vmem>>, vector<8x32x32xbf16>
    "tpu.trace_start"() <{level = 10 : i32, message = "gne,gef->gnf"}> : () -> ()
    %cst_10 = arith.constant dense<0.000000e+00> : vector<8x16x32xf32>
    %36 = tpu.matmul %34, %35, %cst_10 {dimension_numbers = #tpu.dot_dimension_numbers<[2], [1], [1], [2], [0, 0, 0, 1, 1, 2], [0], [0]>} : vector<8x16x32xbf16>, vector<8x32x32xbf16>, vector<8x16x32xf32> -> vector<8x16x32xf32>
    "tpu.trace_stop"() : () -> ()
    %37 = vector.extract_strided_slice %36 {offsets = [0, 0, 0], sizes = [4, 16, 32], strides = [1, 1, 1]} : vector<8x16x32xf32> to vector<4x16x32xf32>
    %38 = vector.shape_cast %37 : vector<4x16x32xf32> to vector<8x8x32xf32>
    %39 = vector.extract_strided_slice %36 {offsets = [4, 0, 0], sizes = [4, 16, 32], strides = [1, 1, 1]} : vector<8x16x32xf32> to vector<4x16x32xf32>
    %40 = vector.shape_cast %39 : vector<4x16x32xf32> to vector<8x8x32xf32>
    %41 = vector.shape_cast %31 : vector<16x32xbf16> to vector<1x2x8x32xbf16>
    %42 = vector.shape_cast %41 : vector<1x2x8x32xbf16> to vector<1x2x8x32xbf16>
    %43 = vector.broadcast %42 : vector<1x2x8x32xbf16> to vector<4x2x8x32xbf16>
    %44 = vector.shape_cast %43 : vector<4x2x8x32xbf16> to vector<8x8x32xbf16>
    %45 = arith.truncf %38 : vector<8x8x32xf32> to vector<8x8x32xbf16>
    "tpu.trace_start"() <{level = 10 : i32, message = "gtf,gsf->gts"}> : () -> ()
    %cst_11 = arith.constant dense<0.000000e+00> : vector<8x8x8xf32>
    %46 = tpu.matmul %45, %44, %cst_11 {dimension_numbers = #tpu.dot_dimension_numbers<[2], [2], [1], [1], [0, 0, 0, 1, 1, 1], [0], [0]>} : vector<8x8x32xbf16>, vector<8x8x32xbf16>, vector<8x8x8xf32> -> vector<8x8x8xf32>
    "tpu.trace_stop"() : () -> ()
    %cst_12 = arith.constant dense<0xFF800000> : vector<8x8xf32>
    %47 = vector.multi_reduction <maximumf>, %46, %cst_12 [2] : vector<8x8x8xf32> to vector<8x8xf32>
    %48 = vector.shape_cast %47 : vector<8x8xf32> to vector<8x8x1xf32>
    %49 = vector.broadcast %48 : vector<8x8x1xf32> to vector<8x8x8xf32>
    %50 = arith.subf %46, %49 : vector<8x8x8xf32>
    %51 = math.exp %50 : vector<8x8x8xf32>
    %cst_13 = arith.constant dense<0.000000e+00> : vector<8x8xf32>
    %52 = vector.multi_reduction <add>, %51, %cst_13 [2] : vector<8x8x8xf32> to vector<8x8xf32>
    %53 = vector.shape_cast %52 : vector<8x8xf32> to vector<8x8x1xf32>
    %54 = tpu.reciprocal %53 {approx = true} : vector<8x8x1xf32> -> vector<8x8x1xf32>
    %55 = vector.broadcast %54 : vector<8x8x1xf32> to vector<8x8x8xf32>
    %56 = arith.mulf %51, %55 : vector<8x8x8xf32>
    %57 = arith.truncf %56 : vector<8x8x8xf32> to vector<8x8x8xbf16>
    %58 = arith.truncf %40 : vector<8x8x32xf32> to vector<8x8x32xbf16>
    "tpu.trace_start"() <{level = 10 : i32, message = "gts,gsf->gtf"}> : () -> ()
    %cst_14 = arith.constant dense<0.000000e+00> : vector<8x8x32xf32>
    %59 = tpu.matmul %57, %58, %cst_14 {dimension_numbers = #tpu.dot_dimension_numbers<[2], [1], [1], [2], [0, 0, 0, 1, 1, 2], [0], [0]>} : vector<8x8x8xbf16>, vector<8x8x32xbf16>, vector<8x8x32xf32> -> vector<8x8x32xf32>
    "tpu.trace_stop"() : () -> ()
    %60 = vector.shape_cast %59 : vector<8x8x32xf32> to vector<4x16x32xf32>
    %cst_15 = arith.constant dense<0.000000e+00> : vector<16x32xf32>
    %61 = vector.multi_reduction <add>, %60, %cst_15 [0] : vector<4x16x32xf32> to vector<16x32xf32>
    %62 = arith.addf %0, %61 : vector<16x32xf32>
    %63 = vector.broadcast %3 : vector<1x32xf32> to vector<16x32xf32>
    %64 = arith.addf %62, %63 : vector<16x32xf32>
    %cst_16 = arith.constant dense<0.000000e+00> : vector<16xf32>
    %65 = vector.multi_reduction <add>, %64, %cst_16 [1] : vector<16x32xf32> to vector<16xf32>
    %66 = vector.shape_cast %65 : vector<16xf32> to vector<16x1xf32>
    %cst_17 = arith.constant 3.200000e+01 : f32
    %67 = vector.broadcast %cst_17 : f32 to vector<16x1xf32>
    %68 = arith.divf %66, %67 : vector<16x1xf32>
    %69 = vector.broadcast %68 : vector<16x1xf32> to vector<16x32xf32>
    %70 = arith.subf %64, %69 : vector<16x32xf32>
    %71 = arith.mulf %70, %70 : vector<16x32xf32>
    %cst_18 = arith.constant dense<0.000000e+00> : vector<16xf32>
    %72 = vector.multi_reduction <add>, %71, %cst_18 [1] : vector<16x32xf32> to vector<16xf32>
    %73 = vector.shape_cast %72 : vector<16xf32> to vector<16x1xf32>
    %cst_19 = arith.constant 3.200000e+01 : f32
    %74 = vector.broadcast %cst_19 : f32 to vector<16x1xf32>
    %75 = arith.divf %73, %74 : vector<16x1xf32>
    %76 = vector.broadcast %68 : vector<16x1xf32> to vector<16x32xf32>
    %77 = arith.subf %64, %76 : vector<16x32xf32>
    %cst_20 = arith.constant 9.99999974E-6 : f32
    %78 = vector.broadcast %cst_20 : f32 to vector<16x1xf32>
    %79 = arith.addf %75, %78 : vector<16x1xf32>
    %80 = math.rsqrt %79 : vector<16x1xf32>
    %81 = vector.broadcast %80 : vector<16x1xf32> to vector<16x32xf32>
    %82 = arith.mulf %77, %81 : vector<16x32xf32>
    %83 = vector.broadcast %6 : vector<1x32xf32> to vector<16x32xf32>
    %84 = arith.mulf %82, %83 : vector<16x32xf32>
    %85 = vector.broadcast %7 : vector<1x32xf32> to vector<16x32xf32>
    %86 = arith.addf %84, %85 : vector<16x32xf32>
    %87 = arith.truncf %86 : vector<16x32xf32> to vector<16x32xbf16>
    %c0_21 = arith.constant 0 : index
    %c0_22 = arith.constant 0 : index
    %88 = vector.load %arg2[%c0_21, %c0_22] : memref<32x128xbf16, #tpu.memory_space<vmem>>, vector<32x128xbf16>
    %cst_23 = arith.constant dense<0.000000e+00> : vector<16x128xf32>
    %89 = tpu.matmul %87, %88, %cst_23 {dimension_numbers = #tpu.dot_dimension_numbers<[1], [0], [0], [1], [0, 0, 1, 1], [], []>} : vector<16x32xbf16>, vector<32x128xbf16>, vector<16x128xf32> -> vector<16x128xf32>
    %90 = vector.broadcast %2 : vector<1x128xf32> to vector<16x128xf32>
    %91 = arith.addf %89, %90 : vector<16x128xf32>
    %cst_24 = arith.constant 0.000000e+00 : f32
    %92 = vector.broadcast %cst_24 : f32 to vector<16x128xf32>
    %93 = arith.maximumf %91, %92 : vector<16x128xf32>
    %94 = arith.truncf %93 : vector<16x128xf32> to vector<16x128xbf16>
    %c0_25 = arith.constant 0 : index
    %c0_26 = arith.constant 0 : index
    %95 = vector.load %arg3[%c0_25, %c0_26] : memref<128x32xbf16, #tpu.memory_space<vmem>>, vector<128x32xbf16>
    %cst_27 = arith.constant dense<0.000000e+00> : vector<16x32xf32>
    %96 = tpu.matmul %94, %95, %cst_27 {dimension_numbers = #tpu.dot_dimension_numbers<[1], [0], [0], [1], [0, 0, 1, 1], [], []>} : vector<16x128xbf16>, vector<128x32xbf16>, vector<16x32xf32> -> vector<16x32xf32>
    %97 = vector.broadcast %8 : vector<1x32xf32> to vector<16x32xf32>
    %98 = arith.addf %96, %97 : vector<16x32xf32>
    %99 = arith.addf %64, %98 : vector<16x32xf32>
    %c0_28 = arith.constant 0 : index
    %c0_29 = arith.constant 0 : index
    %100 = vector.load %arg5[%c0_28, %c0_29] : memref<16x32xf32, #tpu.memory_space<vmem>>, vector<16x32xf32>
    tpu.vector_store %arg5[%c0_28, %c0_29], %99 {strides = array<i32>} : memref<16x32xf32, #tpu.memory_space<vmem>>, vector<16x32xf32>,
    return
  }
}

</mosaic_0001>

<bundles_post_ra>
// kernel: block_forward.1
= control target key start
LH: loop header
LB: loop body
LE: loop exit
PB: predicated region body
PF: predicated region fallthrough
CT: control target
= control target key end

     0   :  { %10 = vsyncpa [#allocation3], 0  ;;  %s2383_s0 = inlined_call_operand.vmem [shape: f32[16,32], index: 0, kind: input, shape index: {}]   ;;  %s2384_s1 = inlined_call_operand.hbm [shape: bf16[8,32,32], index: 1, kind: input, shape index: {}]   ;;  %s2385_s2 = inlined_call_operand.vmem [shape: bf16[32,128], index: 2, kind: input, shape index: {}]   ;;  %s2386_s3 = inlined_call_operand.vmem [shape: bf16[128,32], index: 3, kind: input, shape index: {}]   ;;  %s2387_s4 = inlined_call_operand.vmem [shape: f32[8,128], index: 4, kind: input, shape index: {}]   ;;  %s2388_s5 = inlined_call_operand.hbm [shape: f32[16,32], index: 5, kind: output, shape index: {}]  }
   0x1   :  { %11 = vsyncpa [#allocation4], 0  ;;  %s2063_s18 = smov [#allocation2]  }
   0x2   :  { %s19_s19 = sshll.u32 %s2063_s18, 4  ;;  %s20_s19 = int_to_ptr.vmem [resolvable:$true] %s19_s19 }
   0x3   :  { %s2027_s20 = scalar_lea.vmem %s20_s19, 2048  ;;  %p2032_p1 = scmp.lt.s32.totalorder %s20_s19, %s20_s19 }
   0x4   :  { %p2028_p0 = scmp.ne.s32.totalorder %s20_s19, %s2027_s20  ;;  %p2033_p2 = scmp.lt.s32.totalorder %s2027_s20, %s2027_s20 }
   0x6   :  { %p2034_p3 = por %p2033_p2, %p2032_p1 }
   0x8   :  { %p2035_p4 = pnand %p2034_p3, %p2028_p0 }
   0xa   :  { %2038 = shalt.err (!%p2035_p4)
}
   0xb   :  { %s2064_s21 = smov 64   ;;  %s2065_s22 = smov 4  }
   0xc   :  { %25 = dma.hbm_to_vmem [thread:$0]  %s2384_s1, 2048, %s20_s19, [#allocation3], %s2064_s21, %s2064_s21, %s2065_s22  }
   0xd   :  { %2059 = dma.done.wait [#allocation3], 2048  }
   0xe   :  { %2060 = vsyncadd [#allocation3], 4294965248  ;;  %vm39_vm0 = vcmask 261120   ;;  %v2107_v0 = vld [vmem:[%s2383_s0] sm:$0xff]  ;;  %v2112_v1 = vld [vmem:[%s2383_s0 + $0x8] sm:$0xff]  ;;  %v2066_v16 = vmov 0.0   ;;  %v67_v24 = vlaneseq }
   0xf   :  { %v40_v2 = vsel %vm39_vm0, %v2107_v0, 0.0  ;;  %v43_v3 = vsel %vm39_vm0, %v2112_v1, 0.0  ;;  %v1953_v14 = vld [vmem:[#allocation2 + $0x8] sm:$0xff]   ;;  %v1954_v15 = vld [vmem:[#allocation2 + $0x38] sm:$0xff]   ;;  %1757 = vmatprep.subr.bf16.mxu0 %v2066_v16  ;;  %1781 = vmatprep.subr.bf16.mxu1 %v2066_v16  ;;  %v1955_v17 = vld [vmem:[#allocation2] sm:$0xff]   ;;  %vm2067_vm1 = vmmov 0  }
  0x10   :  { %41 = vadd.xlane.f32.xlu0 %v40_v2  ;;  %1758 = vmatpush3.bf16.msra.mxu0 %v1953_v14  ;;  %v1956_v18 = vld [vmem:[#allocation2 + $0x30] sm:$0xff]   ;;  %v2132_v26 = vshrl.u32 %v67_v24, 7  ;;  %v2138_v28 = vld [vmem:[%s2387_s4] sm:$0xff]  ;;  %v1957_v40 = vld [vmem:[#allocation2 + $0x18] sm:$0xff]   ;;  %vm1010_vm2 = vcmask 1043456   ;;  %vm902_vm3 = vcmask 64512  }
  0x11   :  { %1782 = vmatpush3.bf16.msra.mxu1 %v1954_v15  ;;  %1759 = vmatprep.subr.bf16.mxu0 %v2066_v16  ;;  %v1958_v41 = vld [vmem:[#allocation2 + $0x58] sm:$0xff]   ;;  %v1959_v43 = vld [vmem:[#allocation2 + $0x10] sm:$0xff]   ;;  %v1961_v45 = vld [vmem:[#allocation2 + $0x28] sm:$0xff]  }
  0x12   :  { %1783 = vmatprep.subr.bf16.mxu1 %v2066_v16  ;;  %1761 = vmatprep.mubr.msk.bf16.mxu0 %vm2067_vm1, %v2066_v16  ;;  %v69_v27 = vsub.s32 2, %v2132_v26  ;;  %v75_v31 = vsub.s32 3, %v2132_v26  ;;  %v1960_v44 = vld [vmem:[#allocation2 + $0x50] sm:$0xff]   ;;  %v1962_v46 = vld [vmem:[#allocation2 + $0x78] sm:$0xff]   ;;  %v1963_v47 = vld [vmem:[#allocation2 + $0x20] sm:$0xff]  }
  0x13   :  { %1785 = vmatprep.mubr.msk.bf16.mxu1 %vm2067_vm1, %v2066_v16  ;;  %v1964_v48 = vld [vmem:[#allocation2 + $0x70] sm:$0xff]   ;;  %v1965_v50 = vld [vmem:[#allocation2 + $0x48] sm:$0xff]   ;;  %v1966_v52 = vld [vmem:[#allocation2 + $0x40] sm:$0xff]  }
  0x14   :  { %44 = vadd.xlane.f32.xlu0 %v43_v3  ;;  %1760 = vmatpush3.bf16.msra.mxu0 %v1955_v17  ;;  %v70_v30 = vrot.slane %v2138_v28, %v69_v27  ;;  %v76_v34 = vrot.slane %v2138_v28, %v75_v31  ;;  %v1967_v53 = vld [vmem:[#allocation2 + $0x68] sm:$0xff]   ;;  %v1968_v54 = vld [vmem:[#allocation2 + $0x60] sm:$0xff]  }
  0x15   :  { %1784 = vmatpush3.bf16.msra.mxu1 %v1956_v18  ;;  %1765 = vmatprep.subr.bf16.mxu0 %v2066_v16 }
  0x16   :  { %1797 = vmatprep.subr.bf16.mxu1 %v2066_v16 }
  0x99   :  { %v42_v4 = vpop.xlane.xlu0 %41 }
  0x9a   :  { %v47_v5 = vmul.f32 0.03125, %v42_v4 }
  0x9c   :  { %v49_v6 = vsub.f32 %v2107_v0, %v47_v5 }
  0x9d   :  { %v45_v7 = vpop.xlane.xlu0 %44 }
  0x9e   :  { %v48_v8 = vmul.f32 0.03125, %v45_v7  ;;  %v51_v9 = vmul.f32 %v49_v6, %v49_v6 }
  0xa0   :  { %v50_v10 = vsub.f32 %v2112_v1, %v48_v8  ;;  %v53_v11 = vsel %vm39_vm0, %v51_v9, 0.0 }
  0xa1   :  { %54 = vadd.xlane.f32.xlu1 %v53_v11 }
  0xa2   :  { %v52_v12 = vmul.f32 %v50_v10, %v50_v10 }
  0xa4   :  { %v56_v13 = vsel %vm39_vm0, %v52_v12, 0.0 }
  0xa5   :  { %57 = vadd.xlane.f32.xlu1 %v56_v13 }
 0x12a   :  { %v55_v19 = vpop.xlane.xlu1 %54 }
 0x12b   :  { %v59_v20 = vmul.f32 0.03125, %v55_v19 }
 0x12d   :  { %v61_v21 = vadd.f32 1e-05, %v59_v20 }
 0x12e   :  { %v58_v22 = vpop.xlane.xlu1 %57 }
 0x12f   :  { %1979 = vrsqrt.f32 %v61_v21  ;;  %v60_v23 = vmul.f32 0.03125, %v58_v22 }
 0x131   :  { %v62_v25 = vadd.f32 1e-05, %v60_v23 }
 0x133   :  { %1981 = vrsqrt.f32 %v62_v25 }
 0x13c   :  { %v1980_v29 = vpop.eup %1979 }
 0x13d   :  { %v65_v32 = vmul.f32 %v1980_v29, %v49_v6 }
 0x13f   :  { %v71_v35 = vmul.f32 %v70_v30, %v65_v32 }
 0x140   :  { %v1982_v33 = vpop.eup %1981 }
 0x141   :  { %v66_v36 = vmul.f32 %v1982_v33, %v50_v10  ;;  %v77_v38 = vadd.f32 %v76_v34, %v71_v35 }
 0x143   :  { %v72_v37 = vmul.f32 %v70_v30, %v66_v36  ;;  %v1687_v55 = vpack.c.bf16 %v77_v38, %v77_v38 }
 0x145   :  { %v78_v39 = vadd.f32 %v76_v34, %v72_v37  ;;  %v556_v56 = vsel %vm39_vm0, %v1687_v55, 0 }
 0x147   :  { %v79_v42 = vpack.c.bf16 %v78_v39, %v77_v38  ;;  %v1688_v49 = vpack.c.bf16 %v78_v39, %v78_v39 }
 0x149   :  { %1762 = vmatmul.mubr.msk.bf16.vlgmr.msra.gmra.mxu0 %vm39_vm0, %v79_v42  ;;  %1786 = vmatmul.mubr.msk.bf16.vlgmr.msra.gmra.mxu1 %vm39_vm0, %v79_v42  ;;  %v2166_v51 = vsel %vm39_vm0, %v1688_v49, 0 }
 0x14a   :  { %1766 = vmatpush3.bf16.msra.mxu0 %v1957_v40  ;;  %1798 = vmatpush3.bf16.msra.mxu1 %v1958_v41 }
 0x14b   :  { %1767 = vmatprep.subr.bf16.mxu0 %v2066_v16  ;;  %1799 = vmatprep.subr.bf16.mxu1 %v2066_v16 }
 0x14c   :  { %1769 = vmatprep.mubr.msk.bf16.mxu0 %vm2067_vm1, %v2066_v16  ;;  %1801 = vmatprep.mubr.msk.bf16.mxu1 %vm2067_vm1, %v2066_v16 }
 0x14e   :  { %1768 = vmatpush3.bf16.msra.mxu0 %v1959_v43  ;;  %1800 = vmatpush3.bf16.msra.mxu1 %v1960_v44 }
 0x14f   :  { %1773 = vmatprep.subr.bf16.mxu0 %v2066_v16  ;;  %1813 = vmatprep.subr.bf16.mxu1 %v2066_v16 }
 0x151   :  { %1770 = vmatmul.mubr.msk.bf16.vlgmr.msra.gmra.mxu0 %vm39_vm0, %v79_v42  ;;  %1802 = vmatmul.mubr.msk.bf16.vlgmr.msra.gmra.mxu1 %vm39_vm0, %v79_v42 }
 0x152   :  { %1774 = vmatpush3.bf16.msra.mxu0 %v1961_v45  ;;  %1814 = vmatpush3.bf16.msra.mxu1 %v1962_v46 }
 0x153   :  { %1775 = vmatprep.subr.bf16.mxu0 %v2066_v16  ;;  %1815 = vmatprep.subr.bf16.mxu1 %v2066_v16 }
 0x154   :  { %1777 = vmatprep.mubr.msk.bf16.mxu0 %vm2067_vm1, %v2066_v16  ;;  %1817 = vmatprep.mubr.msk.bf16.mxu1 %vm2067_vm1, %v2066_v16 }
 0x156   :  { %1776 = vmatpush3.bf16.msra.mxu0 %v1963_v47  ;;  %1816 = vmatpush3.bf16.msra.mxu1 %v1964_v48 }
 0x157   :  { %1789 = vmatprep.subr.bf16.mxu0 %v2066_v16  ;;  %1827 = vmatprep.subr.bf16.mxu1 %v2066_v16 }
 0x159   :  { %1778 = vmatmul.mubr.msk.bf16.vlgmr.msra.gmra.mxu0 %vm39_vm0, %v79_v42  ;;  %1818 = vmatmul.mubr.msk.bf16.vlgmr.msra.gmra.mxu1 %vm39_vm0, %v79_v42 }
 0x15a   :  { %1790 = vmatpush3.bf16.msra.mxu0 %v1965_v50  ;;  %1828 = vmatpush3.bf16.xpose.msra.mxu1 %v2166_v51 }
 0x15b   :  { %1791 = vmatprep.subr.bf16.mxu0 %v2066_v16  ;;  %1793 = vmatprep.mubr.msk.bf16.mxu0 %vm2067_vm1, %v2066_v16 }
 0x15c   :  { %1829 = vmatprep.mubr.msk.bf16.mxu1 %vm2067_vm1, %v2066_v16  ;;  %1839 = vmatprep.subr.bf16.mxu1 %v2066_v16 }
 0x15e   :  { %1792 = vmatpush3.bf16.msra.mxu0 %v1966_v52 }
 0x15f   :  { %1805 = vmatprep.subr.bf16.mxu0 %v2066_v16 }
 0x161   :  { %1794 = vmatmul.mubr.msk.bf16.vlgmr.msra.gmra.mxu0 %vm39_vm0, %v79_v42 }
 0x162   :  { %1806 = vmatpush3.bf16.msra.mxu0 %v1967_v53  ;;  %1809 = vmatprep.mubr.msk.bf16.mxu0 %vm2067_vm1, %v2066_v16 }
 0x163   :  { %1807 = vmatprep.subr.bf16.mxu0 %v2066_v16 }
 0x166   :  { %1808 = vmatpush3.bf16.msra.mxu0 %v1968_v54 }
 0x167   :  { %1821 = vmatprep.subr.bf16.mxu0 %v2066_v16 }
 0x169   :  { %1810 = vmatmul.mubr.msk.bf16.vlgmr.msra.gmra.mxu0 %vm39_vm0, %v79_v42 }
 0x16a   :  { %1822 = vmatpush3.bf16.xpose.msra.mxu0 %v556_v56  ;;  %1823 = vmatprep.mubr.msk.bf16.mxu0 %vm2067_vm1, %v2066_v16 }
 0x16b   :  { %1833 = vmatprep.subr.bf16.mxu0 %v2066_v16 }
 0x209   :  { %v161_v57 = vpop.f32.mrf.mxu0  ;;  %v2186_v58 = vpop.f32.mrf.mxu1 }
 0x20a   :  { %v544_v59 = vpack.c.bf16 %v161_v57, %v161_v57  ;;  %v550_v37 = vpack.c.bf16 %v2186_v58, %v2186_v58 }
 0x20b   :  { %v1763_v60 = vpop.f32.mrf.mxu0  ;;  %v1787_v61 = vpop.f32.mrf.mxu1 }
 0x20c   :  { %1824 = vmatmul.mubr.msk.bf16.vlgmr.msra.gmra.mxu0 %vm39_vm0, %v544_v59 }
 0x20d   :  { %1834 = vmatpush3.bf16.xpose.msra.mxu0 %v556_v56  ;;  %v164_v62 = vpop.f32.mrf.mxu0  ;;  %v2189_v63 = vpop.f32.mrf.mxu1  ;;  %1835 = vmatprep.mubr.msk.bf16.mxu0 %vm2067_vm1, %v2066_v16 }
 0x20e   :  { %v545_v2 = vpack.c.bf16 %v164_v62, %v164_v62  ;;  %1845 = vmatprep.subr.bf16.mxu0 %v2066_v16  ;;  %v551_v42 = vpack.c.bf16 %v2189_v63, %v2189_v63 }
 0x20f   :  { %v1764_v3 = vpop.f32.mrf.mxu0  ;;  %v1788_v4 = vpop.f32.mrf.mxu1 }
 0x210   :  { %1830 = vmatmul.mubr.msk.bf16.vlgmr.msra.gmra.mxu1 %vm39_vm0, %v545_v2 }
 0x211   :  { %1840 = vmatpush3.bf16.xpose.msra.mxu1 %v2166_v51  ;;  %v214_v5 = vpop.f32.mrf.mxu0  ;;  %v426_v6 = vpop.f32.mrf.mxu1  ;;  %1841 = vmatprep.mubr.msk.bf16.mxu1 %vm2067_vm1, %v2066_v16 }
 0x212   :  { %v546_v7 = vpack.c.bf16 %v214_v5, %v214_v5  ;;  %v1001_v8 = vpack.c.bf16 %v426_v6, %v426_v6  ;;  %1851 = vmatprep.subr.bf16.mxu1 %v2066_v16 }
 0x213   :  { %v1771_v9 = vpop.f32.mrf.mxu0  ;;  %v1803_v10 = vpop.f32.mrf.mxu1 }
 0x214   :  { %v2200_v11 = vsel %vm1010_vm2, %v1001_v8, 0  ;;  %1836 = vmatmul.mubr.msk.bf16.vlgmr.msra.gmra.mxu0 %vm39_vm0, %v546_v7 }
 0x215   :  { %1846 = vmatpush3.bf16.xpose.msra.mxu0 %v556_v56  ;;  %v217_v12 = vpop.f32.mrf.mxu0  ;;  %v429_v13 = vpop.f32.mrf.mxu1  ;;  %1847 = vmatprep.mubr.msk.bf16.mxu0 %vm2067_vm1, %v2066_v16 }
 0x216   :  { %v547_v14 = vpack.c.bf16 %v217_v12, %v217_v12  ;;  %v1002_v15 = vpack.c.bf16 %v429_v13, %v429_v13  ;;  %1857 = vmatprep.subr.bf16.mxu0 %v2066_v16 }
 0x217   :  { %v1772_v17 = vpop.f32.mrf.mxu0  ;;  %v1804_v18 = vpop.f32.mrf.mxu1 }
 0x218   :  { %v2207_v19 = vsel %vm1010_vm2, %v1002_v15, 0  ;;  %1842 = vmatmul.mubr.msk.bf16.vlgmr.msra.gmra.mxu1 %vm39_vm0, %v547_v14 }
 0x219   :  { %1852 = vmatpush3.bf16.xpose.msra.mxu1 %v2166_v51  ;;  %v267_v20 = vpop.f32.mrf.mxu0  ;;  %v532_v21 = vpop.f32.mrf.mxu1  ;;  %1853 = vmatprep.mubr.msk.bf16.mxu1 %vm2067_vm1, %v2066_v16 }
 0x21a   :  { %v548_v22 = vpack.c.bf16 %v267_v20, %v267_v20  ;;  %v1005_v23 = vpack.c.bf16 %v532_v21, %v532_v21  ;;  %1863 = vmatprep.subr.bf16.mxu1 %v2066_v16 }
 0x21b   :  { %v1779_v24 = vpop.f32.mrf.mxu0  ;;  %v1819_v25 = vpop.f32.mrf.mxu1 }
 0x21c   :  { %v2215_v27 = vsel %vm1010_vm2, %v1005_v23, 0  ;;  %1848 = vmatmul.mubr.msk.bf16.vlgmr.msra.gmra.mxu0 %vm39_vm0, %v548_v22 }
 0x21d   :  { %1858 = vmatpush3.bf16.xpose.msra.mxu0 %v556_v56  ;;  %v270_v29 = vpop.f32.mrf.mxu0  ;;  %v535_v30 = vpop.f32.mrf.mxu1  ;;  %1859 = vmatprep.mubr.msk.bf16.mxu0 %vm2067_vm1, %v2066_v16 }
 0x21e   :  { %v549_v31 = vpack.c.bf16 %v270_v29, %v270_v29  ;;  %v1006_v32 = vpack.c.bf16 %v535_v30, %v535_v30  ;;  %1869 = vmatprep.subr.bf16.mxu0 %v2066_v16 }
 0x21f   :  { %v1780_v33 = vpop.f32.mrf.mxu0  ;;  %v1820_v34 = vpop.f32.mrf.mxu1 }
 0x220   :  { %v2222_v35 = vsel %vm1010_vm2, %v1006_v32, 0  ;;  %1854 = vmatmul.mubr.msk.bf16.vlgmr.msra.gmra.mxu1 %vm39_vm0, %v549_v31 }
 0x221   :  { %1864 = vmatpush3.bf16.xpose.msra.mxu1 %v2166_v51  ;;  %v373_v36 = vpop.f32.mrf.mxu0  ;;  %1865 = vmatprep.mubr.msk.bf16.mxu1 %vm2067_vm1, %v2066_v16 }
 0x222   :  { %v999_v38 = vpack.c.bf16 %v373_v36, %v373_v36  ;;  %1875 = vmatprep.subr.bf16.mxu1 %v2066_v16 }
 0x223   :  { %v1795_v39 = vpop.f32.mrf.mxu0 }
 0x224   :  { %v1012_v40 = vsel %vm1010_vm2, %v999_v38, 0  ;;  %1860 = vmatmul.mubr.msk.bf16.vlgmr.msra.gmra.mxu0 %vm39_vm0, %v550_v37 }
 0x225   :  { %v376_v41 = vpop.f32.mrf.mxu0  ;;  %1870 = vmatpush3.bf16.msra.mxu0 %v1012_v40  ;;  %1871 = vmatprep.mubr.msk.bf16.mxu0 %vm2067_vm1, %v2066_v16 }
 0x226   :  { %v1000_v43 = vpack.c.bf16 %v376_v41, %v376_v41  ;;  %1881 = vmatprep.subr.bf16.mxu0 %v2066_v16 }
 0x227   :  { %v1796_v44 = vpop.f32.mrf.mxu0 }
 0x228   :  { %v1058_v45 = vsel %vm1010_vm2, %v1000_v43, 0  ;;  %1866 = vmatmul.mubr.msk.bf16.vlgmr.msra.gmra.mxu1 %vm39_vm0, %v551_v42 }
 0x229   :  { %v479_v46 = vpop.f32.mrf.mxu0  ;;  %1876 = vmatpush3.bf16.msra.mxu1 %v1058_v45  ;;  %1877 = vmatprep.mubr.msk.bf16.mxu1 %vm2067_vm1, %v2066_v16 }
 0x22a   :  { %v1003_v47 = vpack.c.bf16 %v479_v46, %v479_v46  ;;  %1887 = vmatprep.subr.bf16.mxu1 %v2066_v16 }
 0x22b   :  { %v1811_v48 = vpop.f32.mrf.mxu0 }
 0x22c   :  { %v2244_v49 = vsel %vm1010_vm2, %v1003_v47, 0 }
 0x22d   :  { %v482_v50 = vpop.f32.mrf.mxu0 }
 0x22e   :  { %v1004_v51 = vpack.c.bf16 %v482_v50, %v482_v50 }
 0x22f   :  { %v1812_v52 = vpop.f32.mrf.mxu0 }
 0x230   :  { %v2247_v53 = vsel %vm1010_vm2, %v1004_v51, 0 }
 0x2cc   :  { %v592_v54 = vpop.f32.mrf.mxu0 }
 0x2cd   :  { %v903_v55 = vsel %vm902_vm3, %v592_v54, -inf }
 0x2ce   :  { %904 = vmax.xlane.f32.xlu0 %v903_v55  ;;  %v1825_v56 = vpop.f32.mrf.mxu0 }
 0x2d0   :  { %v595_v57 = vpop.f32.mrf.mxu0  ;;  %v638_v58 = vpop.f32.mrf.mxu1 }
 0x2d1   :  { %v906_v59 = vsel %vm902_vm3, %v638_v58, -inf }
 0x2d2   :  { %907 = vmax.xlane.f32.xlu1 %v906_v59  ;;  %v1826_v60 = vpop.f32.mrf.mxu0  ;;  %v1831_v61 = vpop.f32.mrf.mxu1 }
 0x2d4   :  { %v641_v62 = vpop.f32.mrf.mxu1  ;;  %v681_v63 = vpop.f32.mrf.mxu0 }
 0x2d5   :  { %v909_v2 = vsel %vm902_vm3, %v681_v63, -inf }
 0x2d6   :  { %v1832_v3 = vpop.f32.mrf.mxu1  ;;  %910 = vmax.xlane.f32.xlu0 %v909_v2  ;;  %v1837_v4 = vpop.f32.mrf.mxu0 }
 0x2d8   :  { %v684_v5 = vpop.f32.mrf.mxu0  ;;  %v724_v6 = vpop.f32.mrf.mxu1 }
 0x2d9   :  { %v912_v7 = vsel %vm902_vm3, %v724_v6, -inf }
 0x2da   :  { %913 = vmax.xlane.f32.xlu1 %v912_v7  ;;  %v1838_v8 = vpop.f32.mrf.mxu0  ;;  %v1843_v9 = vpop.f32.mrf.mxu1 }
 0x2dc   :  { %v727_v10 = vpop.f32.mrf.mxu1  ;;  %v767_v12 = vpop.f32.mrf.mxu0 }
 0x2dd   :  { %v915_v13 = vsel %vm902_vm3, %v767_v12, -inf }
 0x2de   :  { %v1844_v14 = vpop.f32.mrf.mxu1  ;;  %916 = vmax.xlane.f32.xlu0 %v915_v13  ;;  %v1849_v15 = vpop.f32.mrf.mxu0 }
 0x2e0   :  { %v770_v17 = vpop.f32.mrf.mxu0  ;;  %v810_v18 = vpop.f32.mrf.mxu1 }
 0x2e1   :  { %v918_v20 = vsel %vm902_vm3, %v810_v18, -inf }
 0x2e2   :  { %919 = vmax.xlane.f32.xlu1 %v918_v20  ;;  %v1850_v21 = vpop.f32.mrf.mxu0  ;;  %v1855_v22 = vpop.f32.mrf.mxu1 }
 0x2e4   :  { %v813_v23 = vpop.f32.mrf.mxu1  ;;  %v853_v24 = vpop.f32.mrf.mxu0 }
 0x2e5   :  { %v921_v25 = vsel %vm902_vm3, %v853_v24, -inf }
 0x2e6   :  { %v1856_v29 = vpop.f32.mrf.mxu1  ;;  %922 = vmax.xlane.f32.xlu0 %v921_v25  ;;  %v1861_v30 = vpop.f32.mrf.mxu0 }
 0x2e8   :  { %v856_v31 = vpop.f32.mrf.mxu0  ;;  %v896_v32 = vpop.f32.mrf.mxu1 }
 0x2e9   :  { %v924_v33 = vsel %vm902_vm3, %v896_v32, -inf }
 0x2ea   :  { %925 = vmax.xlane.f32.xlu1 %v924_v33  ;;  %v1862_v34 = vpop.f32.mrf.mxu0  ;;  %v1867_v36 = vpop.f32.mrf.mxu1 }
 0x2ec   :  { %v899_v37 = vpop.f32.mrf.mxu1 }
 0x2ee   :  { %v1868_v38 = vpop.f32.mrf.mxu1 }
 0x357   :  { %v905_v39 = vpop.xlane.xlu0 %904 }
 0x358   :  { %v927_v40 = vsub.f32 %v592_v54, %v905_v39 }
 0x35a   :  { %v935_v41 = vmul.f32 1.442695, %v927_v40 }
 0x35b   :  { %v908_v42 = vpop.xlane.xlu1 %907 }
 0x35c   :  { %1983 = vpow2.f32 %v935_v41  ;;  %v928_v43 = vsub.f32 %v638_v58, %v908_v42 }
 0x35e   :  { %v937_v44 = vmul.f32 1.442695, %v928_v43 }
 0x35f   :  { %v911_v45 = vpop.xlane.xlu0 %910 }
 0x360   :  { %1985 = vpow2.f32 %v937_v44  ;;  %v929_v46 = vsub.f32 %v681_v63, %v911_v45 }
 0x362   :  { %v939_v47 = vmul.f32 1.442695, %v929_v46 }
 0x363   :  { %v914_v48 = vpop.xlane.xlu1 %913 }
 0x364   :  { %1987 = vpow2.f32 %v939_v47  ;;  %v930_v50 = vsub.f32 %v724_v6, %v914_v48 }
 0x366   :  { %v941_v51 = vmul.f32 1.442695, %v930_v50 }
 0x367   :  { %v917_v52 = vpop.xlane.xlu0 %916 }
 0x368   :  { %1989 = vpow2.f32 %v941_v51  ;;  %v931_v55 = vsub.f32 %v767_v12, %v917_v52 }
 0x369   :  { %v1984_v56 = vpop.eup %1983 }
 0x36a   :  { %v943_v57 = vmul.f32 1.442695, %v931_v55  ;;  %v951_v54 = vsel %vm902_vm3, %v1984_v56, 0.0 }
 0x36b   :  { %v920_v59 = vpop.xlane.xlu1 %919  ;;  %952 = vadd.xlane.f32.xlu0 %v951_v54 }
 0x36c   :  { %1991 = vpow2.f32 %v943_v57  ;;  %v932_v58 = vsub.f32 %v810_v18, %v920_v59 }
 0x36d   :  { %v1986_v60 = vpop.eup %1985 }
 0x36e   :  { %v945_v61 = vmul.f32 1.442695, %v932_v58  ;;  %v954_v62 = vsel %vm902_vm3, %v1986_v60, 0.0 }
 0x36f   :  { %955 = vadd.xlane.f32.xlu1 %v954_v62  ;;  %v923_v63 = vpop.xlane.xlu0 %922 }
 0x370   :  { %1993 = vpow2.f32 %v945_v61  ;;  %v933_v2 = vsub.f32 %v853_v24, %v923_v63 }
 0x371   :  { %v1988_v3 = vpop.eup %1987 }
 0x372   :  { %v947_v4 = vmul.f32 1.442695, %v933_v2  ;;  %v957_v5 = vsel %vm902_vm3, %v1988_v3, 0.0 }
 0x373   :  { %v926_v6 = vpop.xlane.xlu1 %925  ;;  %958 = vadd.xlane.f32.xlu0 %v957_v5 }
 0x374   :  { %1995 = vpow2.f32 %v947_v4  ;;  %v934_v7 = vsub.f32 %v896_v32, %v926_v6 }
 0x375   :  { %v1990_v8 = vpop.eup %1989 }
 0x376   :  { %v949_v9 = vmul.f32 1.442695, %v934_v7  ;;  %v960_v10 = vsel %vm902_vm3, %v1990_v8, 0.0 }
 0x377   :  { %961 = vadd.xlane.f32.xlu1 %v960_v10 }
 0x378   :  { %1997 = vpow2.f32 %v949_v9 }
 0x379   :  { %v1992_v12 = vpop.eup %1991 }
 0x37a   :  { %v963_v13 = vsel %vm902_vm3, %v1992_v12, 0.0 }
 0x37b   :  { %964 = vadd.xlane.f32.xlu0 %v963_v13 }
 0x37d   :  { %v1994_v14 = vpop.eup %1993 }
 0x37e   :  { %v966_v15 = vsel %vm902_vm3, %v1994_v14, 0.0 }
 0x37f   :  { %967 = vadd.xlane.f32.xlu1 %v966_v15 }
 0x381   :  { %v1996_v17 = vpop.eup %1995 }
 0x382   :  { %v969_v18 = vsel %vm902_vm3, %v1996_v17, 0.0 }
 0x383   :  { %970 = vadd.xlane.f32.xlu0 %v969_v18 }
 0x385   :  { %v2264_v20 = vpop.eup %1997 }
 0x386   :  { %v972_v21 = vsel %vm902_vm3, %v2264_v20, 0.0 }
 0x387   :  { %973 = vadd.xlane.f32.xlu1 %v972_v21  ;;  %v1394_v21 = vsub.s32 1, %v2132_v26 }
 0x3f4   :  { %v953_v22 = vpop.xlane.xlu0 %952 }
 0x3f5   :  { %1999 = vrcp.f32 %v953_v22 }
 0x3f8   :  { %v956_v23 = vpop.xlane.xlu1 %955 }
 0x3f9   :  { %2001 = vrcp.f32 %v956_v23 }
 0x3fc   :  { %v959_v24 = vpop.xlane.xlu0 %958 }
 0x3fd   :  { %2003 = vrcp.f32 %v959_v24 }
 0x400   :  { %v962_v25 = vpop.xlane.xlu1 %961 }
 0x401   :  { %2005 = vrcp.f32 %v962_v25 }
 0x402   :  { %v2000_v29 = vpop.eup %1999 }
 0x403   :  { %v983_v30 = vmul.f32 %v2000_v29, %v1984_v56 }
 0x404   :  { %v965_v31 = vpop.xlane.xlu0 %964 }
 0x405   :  { %2007 = vrcp.f32 %v965_v31  ;;  %v991_v32 = vpack.c.bf16 %v983_v30, %v983_v30 }
 0x406   :  { %v2002_v33 = vpop.eup %2001 }
 0x407   :  { %1872 = vmatmul.mubr.msk.bf16.vlgmr.msra.gmra.mxu0 %vm902_vm3, %v991_v32  ;;  %v984_v34 = vmul.f32 %v2002_v33, %v1986_v60 }
 0x408   :  { %1882 = vmatpush3.bf16.msra.mxu0 %v2200_v11  ;;  %v968_v36 = vpop.xlane.xlu1 %967  ;;  %1883 = vmatprep.mubr.msk.bf16.mxu0 %vm2067_vm1, %v2066_v16 }
 0x409   :  { %2009 = vrcp.f32 %v968_v36  ;;  %v992_v37 = vpack.c.bf16 %v984_v34, %v984_v34  ;;  %1893 = vmatprep.subr.bf16.mxu0 %v2066_v16 }
 0x40a   :  { %v2004_v38 = vpop.eup %2003 }
 0x40b   :  { %1878 = vmatmul.mubr.msk.bf16.vlgmr.msra.gmra.mxu1 %vm902_vm3, %v992_v37  ;;  %v985_v39 = vmul.f32 %v2004_v38, %v1988_v3  ;;  %v1395_v37 = vrot.slane %v2138_v28, %v1394_v21 }
 0x40c   :  { %1888 = vmatpush3.bf16.msra.mxu1 %v2207_v19  ;;  %v971_v40 = vpop.xlane.xlu0 %970  ;;  %1889 = vmatprep.mubr.msk.bf16.mxu1 %vm2067_vm1, %v2066_v16 }
 0x40d   :  { %2011 = vrcp.f32 %v971_v40  ;;  %v993_v11 = vpack.c.bf16 %v985_v39, %v985_v39  ;;  %1899 = vmatprep.subr.bf16.mxu1 %v2066_v16 }
 0x40e   :  { %v2006_v41 = vpop.eup %2005 }
 0x40f   :  { %1884 = vmatmul.mubr.msk.bf16.vlgmr.msra.gmra.mxu0 %vm902_vm3, %v993_v11  ;;  %v986_v42 = vmul.f32 %v2006_v41, %v1990_v8 }
 0x410   :  { %1894 = vmatpush3.bf16.msra.mxu0 %v2244_v49  ;;  %v974_v43 = vpop.xlane.xlu1 %973  ;;  %1895 = vmatprep.mubr.msk.bf16.mxu0 %vm2067_vm1, %v2066_v16 }
 0x411   :  { %2013 = vrcp.f32 %v974_v43  ;;  %v994_v19 = vpack.c.bf16 %v986_v42, %v986_v42  ;;  %1905 = vmatprep.subr.bf16.mxu0 %v2066_v16 }
 0x412   :  { %v2008_v44 = vpop.eup %2007 }
 0x413   :  { %1890 = vmatmul.mubr.msk.bf16.vlgmr.msra.gmra.mxu1 %vm902_vm3, %v994_v19  ;;  %v987_v45 = vmul.f32 %v2008_v44, %v1992_v12 }
 0x414   :  { %1900 = vmatpush3.bf16.msra.mxu1 %v2247_v53  ;;  %1901 = vmatprep.mubr.msk.bf16.mxu1 %vm2067_vm1, %v2066_v16 }
 0x415   :  { %v995_v46 = vpack.c.bf16 %v987_v45, %v987_v45  ;;  %1911 = vmatprep.subr.bf16.mxu1 %v2066_v16 }
 0x416   :  { %v2010_v49 = vpop.eup %2009 }
 0x417   :  { %1896 = vmatmul.mubr.msk.bf16.vlgmr.msra.gmra.mxu0 %vm902_vm3, %v995_v46  ;;  %v988_v47 = vmul.f32 %v2010_v49, %v1994_v14 }
 0x418   :  { %1906 = vmatpush3.bf16.msra.mxu0 %v2215_v27  ;;  %1907 = vmatprep.mubr.msk.bf16.mxu0 %vm2067_vm1, %v2066_v16 }
 0x419   :  { %v996_v48 = vpack.c.bf16 %v988_v47, %v988_v47  ;;  %1917 = vmatprep.subr.bf16.mxu0 %v2066_v16 }
 0x41a   :  { %v2012_v50 = vpop.eup %2011 }
 0x41b   :  { %1902 = vmatmul.mubr.msk.bf16.vlgmr.msra.gmra.mxu1 %vm902_vm3, %v996_v48  ;;  %v989_v53 = vmul.f32 %v2012_v50, %v1996_v17 }
 0x41c   :  { %1912 = vmatpush3.bf16.msra.mxu1 %v2222_v35  ;;  %1913 = vmatprep.mubr.msk.bf16.mxu1 %vm2067_vm1, %v2066_v16 }
 0x41d   :  { %v997_v51 = vpack.c.bf16 %v989_v53, %v989_v53  ;;  %1925 = vmatprep.subr.bf16.mxu1 %v2066_v16 }
 0x41e   :  { %v2014_v52 = vpop.eup %2013 }
 0x41f   :  { %1908 = vmatmul.mubr.msk.bf16.vlgmr.msra.gmra.mxu0 %vm902_vm3, %v997_v51  ;;  %v990_v27 = vmul.f32 %v2014_v52, %v2264_v20 }
 0x420   :  { %1921 = vmatprep.mubr.msk.bf16.mxu0 %vm2067_vm1, %v2066_v16 }
 0x421   :  { %v998_v55 = vpack.c.bf16 %v990_v27, %v990_v27 }
 0x423   :  { %1914 = vmatmul.mubr.msk.bf16.vlgmr.msra.gmra.mxu1 %vm902_vm3, %v998_v55 }
 0x424   :  { %1941 = vmatprep.mubr.msk.bf16.mxu1 %vm2067_vm1, %v2066_v16 }
 0x4c7   :  { %v1048_v35 = vpop.f32.mrf.mxu0 }
 0x4c8   :  { %v1376_v14 = vsel %vm39_vm0, %v1048_v35, 0.0 }
 0x4c9   :  { %v1873_v56 = vpop.f32.mrf.mxu0 }
 0x4cb   :  { %v1051_v57 = vpop.f32.mrf.mxu0  ;;  %v1094_v54 = vpop.f32.mrf.mxu1 }
 0x4cc   :  { %v1383_v29 = vsel %vm39_vm0, %v1094_v54, 0.0  ;;  %v1969_v54 = vld [vmem:[%s2385_s2 + $0x8] sm:$0xff]  }
 0x4cd   :  { %v1874_v59 = vpop.f32.mrf.mxu0  ;;  %v1879_v58 = vpop.f32.mrf.mxu1  ;;  %1918 = vmatpush3.bf16.msra.mxu0 %v1969_v54 }
 0x4ce   :  { %v1970_v59 = vld [vmem:[%s2385_s2] sm:$0xff]   ;;  %1919 = vmatprep.subr.bf16.mxu0 %v2066_v16  ;;  %v1971_v58 = vld [vmem:[%s2386_s3 + $0x38] sm:$0xff]  }
 0x4cf   :  { %v1097_v60 = vpop.f32.mrf.mxu1  ;;  %v1140_v61 = vpop.f32.mrf.mxu0  ;;  %1926 = vmatpush3.bf16.msra.mxu1 %v1971_v58 }
 0x4d0   :  { %v1377_v10 = vsel %vm39_vm0, %v1140_v61, 0.0  ;;  %v1972_v60 = vld [vmem:[%s2386_s3 + $0x30] sm:$0xff]   ;;  %1927 = vmatprep.subr.bf16.mxu1 %v2066_v16  ;;  %v1973_v61 = vld [vmem:[%s2386_s3 + $0x28] sm:$0xff]  }
 0x4d1   :  { %v1880_v62 = vpop.f32.mrf.mxu1  ;;  %v1885_v63 = vpop.f32.mrf.mxu0  ;;  %v1378_v17 = vadd.f32 %v1377_v10, %v1376_v14  ;;  %1920 = vmatpush3.bf16.msra.mxu0 %v1970_v59 }
 0x4d2   :  { %v1974_v62 = vld [vmem:[%s2386_s3 + $0x20] sm:$0xff]   ;;  %v1975_v63 = vld [vmem:[%s2386_s3 + $0x18] sm:$0xff]  }
 0x4d3   :  { %v1143_v2 = vpop.f32.mrf.mxu0  ;;  %v1186_v3 = vpop.f32.mrf.mxu1  ;;  %1928 = vmatpush3.bf16.msra.mxu1 %v1972_v60 }
 0x4d4   :  { %v1384_v22 = vsel %vm39_vm0, %v1186_v3, 0.0  ;;  %1929 = vmatprep.subr.bf16.mxu1 %v2066_v16 }
 0x4d5   :  { %v1886_v4 = vpop.f32.mrf.mxu0  ;;  %v1891_v5 = vpop.f32.mrf.mxu1  ;;  %v1385_v32 = vadd.f32 %v1384_v22, %v1383_v29  ;;  %v1978_v29 = vld [vmem:[%s2386_s3] sm:$0xff]  }
 0x4d7   :  { %v1189_v6 = vpop.f32.mrf.mxu1  ;;  %v1232_v7 = vpop.f32.mrf.mxu0  ;;  %1930 = vmatpush3.bf16.msra.mxu1 %v1973_v61 }
 0x4d8   :  { %v1379_v15 = vsel %vm39_vm0, %v1232_v7, 0.0  ;;  %1931 = vmatprep.subr.bf16.mxu1 %v2066_v16 }
 0x4d9   :  { %v1892_v8 = vpop.f32.mrf.mxu1  ;;  %v1897_v9 = vpop.f32.mrf.mxu0  ;;  %v1380_v23 = vadd.f32 %v1379_v15, %v1378_v17 }
 0x4da   :  { %v1426_v8 = vsub.s32 4, %v2132_v26 }
 0x4db   :  { %v1235_v12 = vpop.f32.mrf.mxu0  ;;  %v1278_v13 = vpop.f32.mrf.mxu1  ;;  %1932 = vmatpush3.bf16.msra.mxu1 %v1974_v62 }
 0x4dc   :  { %v1386_v30 = vsel %vm39_vm0, %v1278_v13, 0.0  ;;  %1933 = vmatprep.subr.bf16.mxu1 %v2066_v16  ;;  %v1427_v12 = vrot.slane %v2138_v28, %v1426_v8  ;;  %v1432_v13 = vsub.s32 5, %v2132_v26 }
 0x4dd   :  { %v1898_v18 = vpop.f32.mrf.mxu0  ;;  %v1903_v20 = vpop.f32.mrf.mxu1  ;;  %v1387_v38 = vadd.f32 %v1386_v30, %v1385_v32  ;;  %v1443_v30 = vsub.s32 0, %v2132_v26 }
 0x4de   :  { %v1433_v18 = vrot.slane %v2138_v28, %v1432_v13 }
 0x4df   :  { %v1281_v24 = vpop.f32.mrf.mxu1  ;;  %v1324_v25 = vpop.f32.mrf.mxu0  ;;  %1934 = vmatpush3.bf16.msra.mxu1 %v1975_v63 }
 0x4e0   :  { %v1381_v31 = vsel %vm39_vm0, %v1324_v25, 0.0  ;;  %1935 = vmatprep.subr.bf16.mxu1 %v2066_v16  ;;  %v1976_v24 = vld [vmem:[%s2386_s3 + $0x10] sm:$0xff]   ;;  %v1977_v25 = vld [vmem:[%s2386_s3 + $0x8] sm:$0xff]   ;;  %s2068_s3 = smov [#allocation5]  }
 0x4e1   :  { %v1382_v33 = vadd.f32 %v1381_v31, %v1380_v23  ;;  %v1904_v34 = vpop.f32.mrf.mxu1  ;;  %v1909_v36 = vpop.f32.mrf.mxu0  ;;  %v1444_v31 = vrot.slane %v2138_v28, %v1443_v30  ;;  %s1622_s22 = sshll.u32 %s2068_s3, 4  ;;  %s1623_s22 = int_to_ptr.vmem [resolvable:$true] %s1622_s22 }
 0x4e2   :  { %s2039_s23 = scalar_lea.vmem %s1623_s22, 256  ;;  %p2044_p6 = scmp.lt.s32.totalorder %s1623_s22, %s1623_s22 }
 0x4e3   :  { %v1390_v39 = vadd.f32 %v1382_v33, %v2107_v0  ;;  %v1327_v40 = vpop.f32.mrf.mxu0  ;;  %v1370_v11 = vpop.f32.mrf.mxu1  ;;  %1936 = vmatpush3.bf16.msra.mxu1 %v1976_v24  ;;  %p2040_p5 = scmp.ne.s32.totalorder %s1623_s22, %s2039_s23  ;;  %p2045_p7 = scmp.lt.s32.totalorder %s2039_s23, %s2039_s23 }
 0x4e4   :  { %v1388_v41 = vsel %vm39_vm0, %v1370_v11, 0.0  ;;  %1937 = vmatprep.subr.bf16.mxu1 %v2066_v16 }
 0x4e5   :  { %v1389_v42 = vadd.f32 %v1388_v41, %v1387_v38  ;;  %v1910_v43 = vpop.f32.mrf.mxu0  ;;  %v1915_v19 = vpop.f32.mrf.mxu1  ;;  %v2316_v44 = vadd.f32 %v1395_v37, %v1390_v39  ;;  %p2046_p8 = por %p2045_p7, %p2044_p6 }
 0x4e7   :  { %v1391_v45 = vadd.f32 %v1389_v42, %v2112_v1  ;;  %v1373_v46 = vpop.f32.mrf.mxu1  ;;  %v1398_v49 = vsel %vm39_vm0, %v2316_v44, 0.0  ;;  %1938 = vmatpush3.bf16.msra.mxu1 %v1977_v25  ;;  %p2047_p9 = pnand %p2046_p8, %p2040_p5 }
 0x4e8   :  { %1399 = vadd.xlane.f32.xlu0 %v1398_v49  ;;  %1939 = vmatprep.subr.bf16.mxu1 %v2066_v16  ;;  %v1522_v16 = vsub.s32 6, %v2132_v26 }
 0x4e9   :  { %v1916_v47 = vpop.f32.mrf.mxu1  ;;  %v2321_v48 = vadd.f32 %v1395_v37, %v1391_v45 }
 0x4ea   :  { %v1523_v41 = vrot.slane %v2138_v28, %v1522_v16 }
 0x4eb   :  { %v1401_v0 = vsel %vm39_vm0, %v2321_v48, 0.0  ;;  %1940 = vmatpush3.bf16.msra.mxu1 %v1978_v29 }
 0x4ec   :  { %1402 = vadd.xlane.f32.xlu1 %v1401_v0 }
 0x571   :  { %v1400_v50 = vpop.xlane.xlu0 %1399 }
 0x572   :  { %v1404_v53 = vmul.f32 0.03125, %v1400_v50 }
 0x574   :  { %v1406_v51 = vsub.f32 %v2316_v44, %v1404_v53 }
 0x575   :  { %v1403_v52 = vpop.xlane.xlu1 %1402 }
 0x576   :  { %v1405_v27 = vmul.f32 0.03125, %v1403_v52  ;;  %v1408_v55 = vmul.f32 %v1406_v51, %v1406_v51 }
 0x578   :  { %v1407_v1 = vsub.f32 %v2321_v48, %v1405_v27  ;;  %v1410_v35 = vsel %vm39_vm0, %v1408_v55, 0.0 }
 0x579   :  { %1411 = vadd.xlane.f32.xlu0 %v1410_v35 }
 0x57a   :  { %v1409_v56 = vmul.f32 %v1407_v1, %v1407_v1 }
 0x57c   :  { %v1413_v57 = vsel %vm39_vm0, %v1409_v56, 0.0 }
 0x57d   :  { %1414 = vadd.xlane.f32.xlu1 %v1413_v57 }
 0x602   :  { %v1412_v2 = vpop.xlane.xlu0 %1411 }
 0x603   :  { %v1416_v3 = vmul.f32 0.03125, %v1412_v2 }
 0x605   :  { %v1418_v4 = vadd.f32 1e-05, %v1416_v3 }
 0x606   :  { %v1415_v5 = vpop.xlane.xlu1 %1414 }
 0x607   :  { %2015 = vrsqrt.f32 %v1418_v4  ;;  %v1417_v6 = vmul.f32 0.03125, %v1415_v5 }
 0x609   :  { %v1419_v7 = vadd.f32 1e-05, %v1417_v6 }
 0x60b   :  { %2017 = vrsqrt.f32 %v1419_v7 }
 0x614   :  { %v2016_v9 = vpop.eup %2015 }
 0x615   :  { %v1422_v10 = vmul.f32 %v2016_v9, %v1406_v51 }
 0x617   :  { %v1428_v17 = vmul.f32 %v1427_v12, %v1422_v10 }
 0x618   :  { %v2018_v14 = vpop.eup %2017 }
 0x619   :  { %v1423_v15 = vmul.f32 %v2018_v14, %v1407_v1  ;;  %v1434_v21 = vadd.f32 %v1433_v18, %v1428_v17 }
 0x61b   :  { %v1429_v20 = vmul.f32 %v1427_v12, %v1423_v15 }
 0x61d   :  { %v1435_v22 = vadd.f32 %v1433_v18, %v1429_v20 }
 0x61f   :  { %v1436_v23 = vpack.c.bf16 %v1435_v22, %v1434_v21 }
 0x621   :  { %1922 = vmatmul.mubr.msk.bf16.vlgmr.msra.gmra.mxu0 %vm39_vm0, %v1436_v23 }
 0x6e1   :  { %v1494_v32 = vpop.f32.mrf.mxu0 }
 0x6e2   :  { %v1495_v34 = vadd.f32 %v1494_v32, %v1444_v31 }
 0x6e3   :  { %v1923_v33 = vpop.f32.mrf.mxu0 }
 0x6e4   :  { %v1501_v39 = vmax.f32 %v1495_v34, 0.0 }
 0x6e5   :  { %v1497_v36 = vpop.f32.mrf.mxu0 }
 0x6e6   :  { %v1498_v37 = vadd.f32 %v1497_v36, %v1444_v31 }
 0x6e7   :  { %v1924_v38 = vpop.f32.mrf.mxu0 }
 0x6e8   :  { %v1502_v40 = vmax.f32 %v1498_v37, 0.0 }
 0x6ea   :  { %v1503_v11 = vpack.c.bf16 %v1502_v40, %v1501_v39 }
 0x6ec   :  { %1942 = vmatmul.mubr.bf16.vlgmr.msra.gmra.mxu1 %v1503_v11 }
 0x7ac   :  { %v1606_v42 = vpop.f32.mrf.mxu1 }
 0x7ad   :  { %v1607_v43 = vadd.f32 %v1606_v42, %v1523_v41 }
 0x7ae   :  { %v1943_v19 = vpop.f32.mrf.mxu1 }
 0x7af   :  { %v1613_v45 = vadd.f32 %v1607_v43, %v2316_v44 }
 0x7b0   :  { %v1609_v46 = vpop.f32.mrf.mxu1 }
 0x7b1   :  { %1615 = vst.msk [vmem:[#allocation5] sm:$0xff] %vm39_vm0, %v1613_v45  ;;  %v1610_v49 = vadd.f32 %v1609_v46, %v1523_v41 }
 0x7b2   :  { %v1944_v47 = vpop.f32.mrf.mxu1 }
 0x7b3   :  { %v1614_v0 = vadd.f32 %v1610_v49, %v2321_v48 }
 0x7b5   :  { %1616 = vst.msk [vmem:[#allocation5 + $0x8] sm:$0xff] %vm39_vm0, %v1614_v0 }
 0x7b6   :  { %2050 = shalt.err (!%p2047_p9)
}
 0x7b7   :  { %s2069_s24 = smov 128   ;;  %s2070_s25 = smov 8  }
 0x7b8   :  { %1628 = dma.vmem_to_hbm [thread:$0]  %s1623_s22, 256, %s2388_s5, [#allocation4], %s2069_s24, %s2069_s24, %s2070_s25  }
 0x7b9   :  { %2061 = dma.done.wait [#allocation4], 256  }
 0x7ba   :  { %2062 = vsyncadd [#allocation4], 4294967040 }
 0x7bb   :  { %1632 = vsyncpa [#allocation3], 1 }
 0x7bc   :  { %1633 = vsyncpa [#allocation4], 1 }

</bundles_post_ra>
